<compile_context>
chip_gen: v7x
topology: tpu7x:2x2x1
jax: 0.10.0
libtpu: 0.0.40
codegen_flags: <defaults>
</compile_context>

<pallas_src>
import functools

import jax
import jax.numpy as jnp
from jax.experimental import pallas as pl
from jax.experimental.pallas import tpu as pltpu


def attention_head_kernel(x_ref, wqkv_ref, bias_ref, o_ref, *, head_size, hs_pad):
    """One batch-tile of causal single-head attention.

    x_ref    : (Bt, T, C)         bf16
    wqkv_ref : (C, 3*hs_pad)      bf16  (q columns already carry the C**-0.5 scale)
    bias_ref : (T, T)             f32   additive causal bias (0 / -1e30)
    o_ref    : (Bt, T, head_size) f32
    """
    Bt, T, C = x_ref.shape

    # --- fused QKV projection: one (Bt*T, C) @ (C, 3*hs_pad) MXU matmul ------
    xb = x_ref[...].reshape(Bt * T, C)
    qkv = jnp.dot(xb, wqkv_ref[...], preferred_element_type=jnp.float32)
    qkv = qkv.astype(jnp.bfloat16)                     # single cast of q|k|v
    q = qkv[:, 0 * hs_pad:1 * hs_pad].reshape(Bt, T, hs_pad)
    k = qkv[:, 1 * hs_pad:2 * hs_pad].reshape(Bt, T, hs_pad)
    v = qkv[:, 2 * hs_pad:3 * hs_pad].reshape(Bt, T, hs_pad)

    # --- scores + causal bias (scale already folded into the q weight) -------
    s = jnp.einsum('btd,bsd->bts', q, k, preferred_element_type=jnp.float32)
    s = s + bias_ref[...][None, :, :]

    # --- softmax in f32; reciprocal on the EUP --------------------------------
    s = s - jnp.max(s, axis=-1, keepdims=True)
    p = jnp.exp(s)
    p = p * pl.reciprocal(jnp.sum(p, axis=-1, keepdims=True), approx=True)

    # --- weighted values; store only the real head_size columns --------------
    out = jnp.einsum('bts,bsd->btd', p.astype(jnp.bfloat16), v,
                     preferred_element_type=jnp.float32)
    o_ref[...] = out[:, :, :head_size]


def _pick_batch_tile(B, T, C, hs_pad, vmem_budget=24 * 1024 * 1024):
    """Largest batch tile that (a) keeps >=2 grid steps when possible and
    (b) fits a conservative per-tile VMEM estimate."""
    def tile_bytes(bt):
        rows = bt * T
        return (2 * rows * C * 2              # double-buffered bf16 x block
                + rows * 3 * hs_pad * 6       # f32 qkv result + bf16 qkv copy
                + 2 * bt * T * T * 4          # scores + probabilities (f32)
                + 3 * rows * hs_pad * 4       # PV result + double-buffered out
                + 2 * C * 3 * hs_pad * 2)     # double-buffered fused bf16 weight

    divisors = [d for d in range(1, B + 1) if B % d == 0]
    # keep >=2 grid steps where possible (v7x dual-TC sharding + DMA pipelining)
    cands = [d for d in divisors if B // d >= 2] or divisors
    fitting = [d for d in cands if tile_bytes(d) <= vmem_budget] or [min(cands)]
    # smallest tile that still fills MXU rows (>=256) keeps more grid steps for
    # pipelining; otherwise take the biggest tile that fits.
    big_enough = [d for d in fitting if d * T >= 256]
    return min(big_enough) if big_enough else max(fitting)


def attention_head_forward(x, wq, wk, wv, *, batch_tile=None):
    """x: (B, T, C); wq/wk/wv: (C, head_size). Returns (B, T, head_size) f32."""
    B, T, C = x.shape
    head_size = wq.shape[1]

    # Lane-dense internal head dim (zero padding is exact: padded q/k columns
    # contribute 0 to the score contraction; padded v columns are never stored).
    hs_pad = max(128, ((head_size + 127) // 128) * 128)
    pad = hs_pad - head_size
    scale = C ** (-0.5)

    # Fused, pre-padded, pre-scaled, pre-cast QKV weight (one-time wrapper cost).
    wq_p = jnp.pad(wq.astype(jnp.float32) * scale, ((0, 0), (0, pad)))
    wk_p = jnp.pad(wk.astype(jnp.float32), ((0, 0), (0, pad)))
    wv_p = jnp.pad(wv.astype(jnp.float32), ((0, 0), (0, pad)))
    wqkv = jnp.concatenate([wq_p, wk_p, wv_p], axis=1).astype(jnp.bfloat16)

    # Additive causal bias, built once (stays f32; -1e30 is safe in f32 softmax).
    causal = jnp.tril(jnp.ones((T, T), dtype=bool))
    bias = jnp.where(causal, 0.0, -1e30).astype(jnp.float32)

    # Half-width activation DMA: kernel consumes bf16 x.
    x_bf = x.astype(jnp.bfloat16)

    bt = _pick_batch_tile(B, T, C, hs_pad) if batch_tile is None else batch_tile
    assert B % bt == 0, "batch must be divisible by batch_tile"
    grid = (B // bt,)

    out = pl.pallas_call(
        functools.partial(attention_head_kernel,
                          head_size=head_size, hs_pad=hs_pad),
        out_shape=jax.ShapeDtypeStruct((B, T, head_size), jnp.float32),
        grid=grid,
        in_specs=[
            pl.BlockSpec((bt, T, C), lambda b: (b, 0, 0)),
            pl.BlockSpec((C, 3 * hs_pad), lambda b: (0, 0)),   # grid-invariant
            pl.BlockSpec((T, T), lambda b: (0, 0)),            # grid-invariant
        ],
        out_specs=pl.BlockSpec((bt, T, head_size), lambda b: (b, 0, 0)),
        compiler_params=pltpu.CompilerParams(
            dimension_semantics=("parallel",),
            vmem_limit_bytes=32 * 1024 * 1024),
    )(x_bf, wqkv, bias)

    return out


def attention_head_reference(x, wq, wk, wv):
    """Pure-JAX f32 reference mirroring the PyTorch module."""
    B, T, C = x.shape
    q = x @ wq
    k = x @ wk
    v = x @ wv
    s = jnp.einsum('btd,bsd->bts', q, k) * (C ** (-0.5))
    mask = jnp.tril(jnp.ones((T, T), dtype=bool))
    s = jnp.where(mask[None, :, :], s, -jnp.inf)
    p = jax.nn.softmax(s, axis=-1)
    # dropout p=0.0 -> identity
    return jnp.einsum('bts,bsd->btd', p, v)


if __name__ == "__main__":
    block_size = 16          # max context length (T <= block_size)
    num_embeddings = 32      # C
    head_size = 16
    B, T = 2, 8

    key = jax.random.PRNGKey(0)
    kx, kq, kk, kv = jax.random.split(key, 4)
    x = jax.random.normal(kx, (B, T, num_embeddings), dtype=jnp.float32)
    wscale = num_embeddings ** (-0.5)
    wq = jax.random.normal(kq, (num_embeddings, head_size), jnp.float32) * wscale
    wk = jax.random.normal(kk, (num_embeddings, head_size), jnp.float32) * wscale
    wv = jax.random.normal(kv, (num_embeddings, head_size), jnp.float32) * wscale

    out = attention_head_forward(x, wq, wk, wv)
    out = jax.block_until_ready(out)

    assert out.shape == (B, T, head_size)
    assert bool(jnp.all(jnp.isfinite(out)))

    ref = attention_head_reference(x, wq, wk, wv)
    max_err = float(jnp.max(jnp.abs(out - ref)))
    # bf16 activations/MXU operands + approx reciprocal -> small deviation.
    assert max_err < 5e-2, f"max abs error {max_err}"

    print("KERNEL_OK")
</pallas_src>

<mosaic_0001>
module attributes {stable_mosaic.version = 11 : i64} {
  func.func @attention_head_kernel(%arg0: i32, %arg1: memref<1x8x32xbf16, #tpu.memory_space<vmem>>, %arg2: memref<32x384xbf16, #tpu.memory_space<vmem>>, %arg3: memref<8x8xf32, #tpu.memory_space<vmem>>, %arg4: memref<1x8x16xf32, #tpu.memory_space<vmem>>) attributes {dimension_semantics = [#tpu.dimension_semantics<parallel>], iteration_bounds = array<i64: 2>, scalar_prefetch = 0 : i64, scratch_operands = 0 : i64, tpu.core_type = #tpu.core_type<tc>, window_params = [{transform_indices = @transform_0, window_bounds = array<i64: 1, 8, 32>}, {pipeline_mode = #tpu.pipeline_mode<synchronous>, transform_indices = @transform_1, window_bounds = array<i64: 32, 384>}, {pipeline_mode = #tpu.pipeline_mode<synchronous>, transform_indices = @transform_2, window_bounds = array<i64: 8, 8>}, {transform_indices = @transform_3, window_bounds = array<i64: 1, 8, 16>}]} {
    %c0 = arith.constant 0 : index
    %c0_0 = arith.constant 0 : index
    %c0_1 = arith.constant 0 : index
    %0 = vector.load %arg1[%c0, %c0_0, %c0_1] : memref<1x8x32xbf16, #tpu.memory_space<vmem>>, vector<1x8x32xbf16>
    %1 = vector.shape_cast %0 : vector<1x8x32xbf16> to vector<8x32xbf16>
    %c0_2 = arith.constant 0 : index
    %c0_3 = arith.constant 0 : index
    %2 = vector.load %arg2[%c0_2, %c0_3] : memref<32x384xbf16, #tpu.memory_space<vmem>>, vector<32x384xbf16>
    %cst = arith.constant dense<0.000000e+00> : vector<8x384xf32>
    %3 = tpu.matmul %1, %2, %cst {dimension_numbers = #tpu.dot_dimension_numbers<[1], [0], [0], [1], [0, 0, 1, 1], [], []>} : vector<8x32xbf16>, vector<32x384xbf16>, vector<8x384xf32> -> vector<8x384xf32>
    %4 = arith.truncf %3 : vector<8x384xf32> to vector<8x384xbf16>
    %5 = vector.extract_strided_slice %4 {offsets = [0, 0], sizes = [8, 128], strides = [1, 1]} : vector<8x384xbf16> to vector<8x128xbf16>
    %6 = vector.shape_cast %5 : vector<8x128xbf16> to vector<1x8x128xbf16>
    %7 = vector.extract_strided_slice %4 {offsets = [0, 128], sizes = [8, 128], strides = [1, 1]} : vector<8x384xbf16> to vector<8x128xbf16>
    %8 = vector.shape_cast %7 : vector<8x128xbf16> to vector<1x8x128xbf16>
    %9 = vector.extract_strided_slice %4 {offsets = [0, 256], sizes = [8, 128], strides = [1, 1]} : vector<8x384xbf16> to vector<8x128xbf16>
    %10 = vector.shape_cast %9 : vector<8x128xbf16> to vector<1x8x128xbf16>
    "tpu.trace_start"() <{level = 10 : i32, message = "btd,bsd->bts"}> : () -> ()
    %cst_4 = arith.constant dense<0.000000e+00> : vector<1x8x8xf32>
    %11 = tpu.matmul %6, %8, %cst_4 {dimension_numbers = #tpu.dot_dimension_numbers<[2], [2], [1], [1], [0, 0, 0, 1, 1, 1], [0], [0]>} : vector<1x8x128xbf16>, vector<1x8x128xbf16>, vector<1x8x8xf32> -> vector<1x8x8xf32>
    "tpu.trace_stop"() : () -> ()
    %c0_5 = arith.constant 0 : index
    %c0_6 = arith.constant 0 : index
    %12 = vector.load %arg3[%c0_5, %c0_6] : memref<8x8xf32, #tpu.memory_space<vmem>>, vector<8x8xf32>
    %13 = vector.shape_cast %12 : vector<8x8xf32> to vector<1x8x8xf32>
    %14 = arith.addf %11, %13 : vector<1x8x8xf32>
    %cst_7 = arith.constant dense<0xFF800000> : vector<1x8xf32>
    %15 = vector.multi_reduction <maximumf>, %14, %cst_7 [2] : vector<1x8x8xf32> to vector<1x8xf32>
    %16 = vector.shape_cast %15 : vector<1x8xf32> to vector<1x8x1xf32>
    %17 = vector.broadcast %16 : vector<1x8x1xf32> to vector<1x8x8xf32>
    %18 = arith.subf %14, %17 : vector<1x8x8xf32>
    %19 = math.exp %18 : vector<1x8x8xf32>
    %cst_8 = arith.constant dense<0.000000e+00> : vector<1x8xf32>
    %20 = vector.multi_reduction <add>, %19, %cst_8 [2] : vector<1x8x8xf32> to vector<1x8xf32>
    %21 = vector.shape_cast %20 : vector<1x8xf32> to vector<1x8x1xf32>
    %22 = tpu.reciprocal %21 {approx = true} : vector<1x8x1xf32> -> vector<1x8x1xf32>
    %23 = vector.broadcast %22 : vector<1x8x1xf32> to vector<1x8x8xf32>
    %24 = arith.mulf %19, %23 : vector<1x8x8xf32>
    %25 = arith.truncf %24 : vector<1x8x8xf32> to vector<1x8x8xbf16>
    "tpu.trace_start"() <{level = 10 : i32, message = "bts,bsd->btd"}> : () -> ()
    %cst_9 = arith.constant dense<0.000000e+00> : vector<1x8x128xf32>
    %26 = tpu.matmul %25, %10, %cst_9 {dimension_numbers = #tpu.dot_dimension_numbers<[2], [1], [1], [2], [0, 0, 0, 1, 1, 2], [0], [0]>} : vector<1x8x8xbf16>, vector<1x8x128xbf16>, vector<1x8x128xf32> -> vector<1x8x128xf32>
    "tpu.trace_stop"() : () -> ()
    %27 = vector.extract_strided_slice %26 {offsets = [0, 0, 0], sizes = [1, 8, 16], strides = [1, 1, 1]} : vector<1x8x128xf32> to vector<1x8x16xf32>
    %c0_10 = arith.constant 0 : index
    %c0_11 = arith.constant 0 : index
    %c0_12 = arith.constant 0 : index
    %28 = vector.load %arg4[%c0_10, %c0_11, %c0_12] : memref<1x8x16xf32, #tpu.memory_space<vmem>>, vector<1x8x16xf32>
    tpu.vector_store %arg4[%c0_10, %c0_11, %c0_12], %27 {strides = array<i32>} : memref<1x8x16xf32, #tpu.memory_space<vmem>>, vector<1x8x16xf32>,
    return
  }
  func.func @transform_0(%arg0: i32) -> (i32, i32, i32) {
    %c0_i32 = arith.constant 0 : i32
    %c0_i32_0 = arith.constant 0 : i32
    %c0_i32_1 = arith.constant 0 : i32
    return %arg0, %c0_i32, %c0_i32_0 : i32, i32, i32
  }
  func.func @transform_1(%arg0: i32) -> (i32, i32) {
    %c0_i32 = arith.constant 0 : i32
    %c0_i32_0 = arith.constant 0 : i32
    %c0_i32_1 = arith.constant 0 : i32
    return %c0_i32, %c0_i32_0 : i32, i32
  }
  func.func @transform_2(%arg0: i32) -> (i32, i32) {
    %c0_i32 = arith.constant 0 : i32
    %c0_i32_0 = arith.constant 0 : i32
    %c0_i32_1 = arith.constant 0 : i32
    return %c0_i32, %c0_i32_0 : i32, i32
  }
  func.func @transform_3(%arg0: i32) -> (i32, i32, i32) {
    %c0_i32 = arith.constant 0 : i32
    %c0_i32_0 = arith.constant 0 : i32
    %c0_i32_1 = arith.constant 0 : i32
    return %arg0, %c0_i32, %c0_i32_0 : i32, i32, i32
  }
}

</mosaic_0001>

<bundles_post_ra>
// kernel: tpu_custom_call.1
= control target key start
LH: loop header
LB: loop body
LE: loop exit
PB: predicated region body
PF: predicated region fallthrough
CT: control target
= control target key end

     0   :  { %8 = vsyncpa [#allocation3], 0  ;;  %s1110_s0 = inlined_call_operand.hbm [shape: bf16[2,8,32], index: 0, kind: input, shape index: {}]   ;;  %s1111_s1 = inlined_call_operand.hbm [shape: bf16[32,384], index: 1, kind: input, shape index: {}]   ;;  %s1112_s2 = inlined_call_operand.hbm [shape: f32[8,8], index: 2, kind: input, shape index: {}]   ;;  %s1113_s3 = inlined_call_operand.hbm [shape: f32[2,8,16], index: 3, kind: output, shape index: {}]  }
   0x1   :  { %10 = vsyncpa [#allocation3 + $0x1], 0 }
   0x2   :  { %11 = vsyncpa [#allocation6], 0 }
   0x3   :  { %12 = vsyncpa [#allocation4], 0 }
   0x4   :  { %14 = vsyncpa [#allocation4 + $0x1], 0  ;;  %s872_s12 = smov 0   ;;  %s874_s13 = smov 0  }
   0x5   :  { %s876_s14 = smov 0   ;;  %s878_s15 = smov 0  }
   0x6 LB: > { %s893_s16 = sadd.s32 4294967295, %s841_s15   ;;  %s549_s17 = sadd.s32 4294967294, %s841_s15   ;;  %s841_s15 = sphi %s878_s15, %s1133_s15   ;;  %s837_s14 = sphi %s876_s14, %s1132_s14   ;;  %s833_s13 = sphi %s874_s13, %s1131_s13   ;;  %s829_s12 = sphi %s872_s12, %s1130_s12  }
   0x7   : > { %p40_p0 = scmp.ne.s32.totalorder %s833_s13, %s829_s12  ;;  %p1114_p1 = scmp.eq.s32.totalorder %s893_s16, 0 }
   0x8   : > { %p112_p3 = scmp.eq.s32.totalorder %s549_s17, 1  ;;  %p550_p5 = scmp.ge.s32.totalorder %s841_s15, 1 }
   0x9   : > { %p902_p4 = por %p1114_p1, %p40_p0  ;;  %p119_p7 = scmp.lt.s32.totalorder %s841_s15, 3 }
   0xa   : > { %p907_p6 = por %p112_p3, %p40_p0  ;;  %s843_s21 = smov [#allocation5]  }
   0xb   : > { %s1117_s18 = scalar_select %p902_p4, 1, 0 }
   0xc   : > { %s1118_s19 = scalar_select %p907_p6, 1, 0 }
   0xd   : > { %p912_p8 = pnand %p550_p5, %p119_p7  ;;  %s131_s22 = sshll.u32 %s843_s21, 4  ;;  %s916_s22 = int_to_ptr.vmem [resolvable:$true] %s131_s22 }
   0xe   : > { %s844_s24 = smov [#allocation7]   ;;  %s685_s28 = scalar_lea.hbm %s1111_s1, 768 }
   0xf   : > { %p613_p9 = pneg %p912_p8  ;;  %s145_s25 = sshll.u32 %s844_s24, 4  ;;  %s927_s25 = int_to_ptr.vmem [resolvable:$true] %s145_s25 }
  0x10   : > { %p686_p12 = scmp.ne.s32.totalorder %s1111_s1, %s685_s28  ;;  %p692_p5 = scmp.lt.u32.totalorder %s685_s28, %s1111_s1 }
  0x11   : > { %p923_p11 = pnand %p613_p9, %p1114_p1 }
  0x13   : > { %p687_p13 = pneg %p923_p11 }
  0x15   : > { %p688_p0 = pnand %p687_p13, %p686_p12 }
  0x17   : > { %p689_p3 = pneg %p688_p0 }
  0x19   : > { %p694_p7 = pnand %p692_p5, %p689_p3 }
  0x1b   : > { %697 = shalt.err (!%p694_p7)
}
  0x1c   : > { %s698_s6 = scalar_lea.vmem %s916_s22, 768  ;;  %p706_p2 = scmp.lt.s32.totalorder %s916_s22, %s916_s22 }
  0x1d   : > { %p699_p9 = scmp.ne.s32.totalorder %s916_s22, %s698_s6  ;;  %p707_p12 = scmp.lt.s32.totalorder %s698_s6, %s698_s6 }
  0x1f   : > { %p701_p10 = pnand %p699_p9, %p687_p13  ;;  %p708_p0 = por %p707_p12, %p706_p2 }
  0x21   : > { %p702_p1 = pneg %p701_p10 }
  0x23   : > { %p709_p6 = pnand %p708_p0, %p702_p1 }
  0x25   : > { %712 = shalt.err (!%p709_p6)
}
  0x26   : > { %s845_s7 = smov 192   ;;  %s846_s8 = smov 12  }
  0x27   : > { %616 = dma.hbm_to_vmem [thread:$0]  (!%p923_p11), %s1111_s1, 768, %s916_s22, [#allocation6], %s845_s7, %s845_s7, %s846_s8  }
  0x28   : > { %s713_s21 = scalar_lea.hbm %s1112_s2, 128 }
  0x29   : > { %p714_p2 = scmp.ne.s32.totalorder %s1112_s2, %s713_s21  ;;  %p720_p10 = scmp.lt.u32.totalorder %s713_s21, %s1112_s2 }
  0x2b   : > { %p716_p1 = pnand %p714_p2, %p687_p13 }
  0x2d   : > { %p717_p6 = pneg %p716_p1 }
  0x2f   : > { %p722_p3 = pnand %p720_p10, %p717_p6 }
  0x31   : > { %725 = shalt.err (!%p722_p3)
}
  0x32   : > { %s726_s22 = scalar_lea.vmem %s927_s25, 128  ;;  %p734_p12 = scmp.lt.s32.totalorder %s927_s25, %s927_s25 }
  0x33   : > { %p727_p5 = scmp.ne.s32.totalorder %s927_s25, %s726_s22  ;;  %p735_p0 = scmp.lt.s32.totalorder %s726_s22, %s726_s22 }
  0x35   : > { %p729_p7 = pnand %p727_p5, %p687_p13  ;;  %p736_p2 = por %p735_p0, %p734_p12 }
  0x37   : > { %p730_p9 = pneg %p729_p7 }
  0x39   : > { %p737_p1 = pnand %p736_p2, %p730_p9 }
  0x3b   : > { %740 = shalt.err (!%p737_p1)
}
  0x3c   : > { %619 = dma.hbm_to_vmem [thread:$0]  (!%p923_p11), %s1112_s2, 128, %s927_s25, [#allocation6]  }
  0x3d   : > { %s982_s4 = sadd.s32 1, %s841_s15   ;;  %s27_s23 = sadd.s32 1, %s837_s14 }
  0x3e   : > { %s24_s5 = ssub.s32 %s841_s15, %s982_s4  ;;  %p34_p13 = scmp.ne.s32.totalorder %s837_s14, %s833_s13 }
  0x3f   : > { %p25_p6 = scmp.eq.s32.totalorder %s24_s5, 0  ;;  %p35_p10 = scmp.eq.s32.totalorder %s841_s15, 0 }
  0x40   : > { %p1121_p3 = scmp.eq.s32.totalorder %s893_s16, 1  ;;  %p630_p7 = scmp.lt.s32.totalorder %s841_s15, 2 }
  0x41   : > { %s998_s7 = scalar_select %p25_p6, %s837_s14, %s27_s23  }
  0x42   : > { %p992_p5 = por %p1121_p3, %p34_p13  ;;  %p36_p9 = por %p35_p10, %p34_p13 }
  0x43   : > { %s156_s8 = sand.u32 1, %s837_s14   ;;  %s555_s25 = sshll.u32 %s841_s15, 6 }
  0x44   : > { %s1122_s6 = scalar_select %p992_p5, 1, 0 }
  0x45   : > { %s554_s9 = sshll.u32 %s156_s8, 2  ;;  %s1005_s17 = scalar_lea.hbm %s1110_s0, %s555_s25 }
  0x46   : > { %s160_s21 = scalar_lea.vmem [#allocation2], %s554_s9  ;;  %p1009_p11 = pnand %p630_p7, %p36_p9 }
  0x47   : > { %s167_s24 = sshll.u32 %s160_s21, 4  ;;  %s157_s27 = scalar_lea.sflag [#allocation3], %s156_s8  ;;  %s1007_s24 = int_to_ptr.vmem [resolvable:$true] %s167_s24 }
  0x48   : > { %s741_s28 = scalar_lea.hbm %s1005_s17, 64  ;;  %p743_p0 = pneg %p1009_p11 }
  0x49   : > { %p742_p12 = scmp.ne.s32.totalorder %s1005_s17, %s741_s28  ;;  %s746_s30 = scalar_lea.hbm %s1110_s0, 128 }
  0x4a   : > { %p747_p13 = scmp.lt.u32.totalorder %s1005_s17, %s1110_s0  ;;  %p748_p6 = scmp.lt.u32.totalorder %s746_s30, %s741_s28 }
  0x4b   : > { %p744_p2 = pnand %p743_p0, %p742_p12  ;;  %p750_p3 = scmp.lt.u32.totalorder %s741_s28, %s1005_s17 }
  0x4c   : > { %p749_p10 = por %p748_p6, %p747_p13 }
  0x4d   : > { %p745_p1 = pneg %p744_p2 }
  0x4e   : > { %p751_p7 = por %p750_p3, %p749_p10 }
  0x50   : > { %p752_p9 = pnand %p751_p7, %p745_p1 }
  0x52   : > { %755 = shalt.err (!%p752_p9)
}
  0x53   : > { %s756_s8 = scalar_lea.vmem %s1007_s24, 64  ;;  %s847_s9 = smov [#allocation2]  }
  0x54   : > { %p757_p12 = scmp.ne.s32.totalorder %s1007_s24, %s756_s8  ;;  %s761_s25 = sshll.u32 %s847_s9, 4  ;;  %s762_s25 = int_to_ptr.vmem [resolvable:$false] %s761_s25 }
  0x55   : > { %s763_s10 = scalar_lea.vmem %s762_s25, 128  ;;  %p764_p4 = scmp.lt.s32.totalorder %s1007_s24, %s762_s25 }
  0x56   : > { %p759_p2 = pnand %p757_p12, %p743_p0  ;;  %p765_p13 = scmp.lt.s32.totalorder %s763_s10, %s756_s8 }
  0x58   : > { %p760_p5 = pneg %p759_p2  ;;  %p766_p6 = por %p765_p13, %p764_p4 }
  0x5a   : > { %p767_p10 = pnand %p766_p6, %p760_p5 }
  0x5c   : > { %770 = shalt.err (!%p767_p10)
}
  0x5d   : > { %623 = dma.hbm_to_vmem [thread:$0]  (!%p1009_p11), %s1005_s17, 64, %s1007_s24, %s157_s27  }
  0x5e   : > { %176 = sbr.rel (%p912_p8) target bundleno = 1093 (0x445), region = 32  ;;  %s1041_s11 = sand.u32 (!%p912_p8), 1, %s833_s13  }
  0x5f   : > { %s557_s21 = sshll.u32 (!%p912_p8), %s1041_s11, 2  ;;  %s179_s28 = scalar_lea.sflag (!%p912_p8), [#allocation3], %s1041_s11 }
  0x60   : > { %s182_s22 = scalar_lea.vmem (!%p912_p8), [#allocation2], %s557_s21  ;;  %p1124_p4 = scmp.ne.s32.totalorder (!%p912_p8), %s1117_s18, 0 }
  0x65   : > { %816 = dma.done.wait (%p1124_p4), %s179_s28, 64  }
  0x66   : > { %818 = vsyncadd (%p1124_p4), %s179_s28, 4294967232  ;;  %p1125_p5 = scmp.eq.s32.totalorder %s893_s16, 0 }
  0x68   : > { %820 = dma.done.wait (%p1125_p5), [#allocation6], 896   ;;  %p1126_p11 = pmov %p1125_p5 }
  0x69   : > { %v848_v0 = vmov 0   ;;  %v673_v1 = vld [vmem:[#allocation5 + $0x4] ss:$12 sps:$4 sm:$0xff]   ;;  %v675_v2 = vld [vmem:[#allocation5] ss:$12 sps:$4 sm:$0xff]   ;;  %vm255_vm0 = vcmask 261120  }
  0x6a   : > { %822 = vsyncadd (%p1126_p11), [#allocation6], 4294966400  ;;  %291 = vmatprep.mubr.bf16.mxu0 %v848_v0  ;;  %259 = vmatprep.subr.bf16.mxu0 %v673_v1  ;;  %v676_v3 = vld [vmem:[#allocation5 + $0x1c] ss:$12 sps:$4 sm:$0xff]   ;;  %v678_v4 = vld [vmem:[#allocation5 + $0x18] ss:$12 sps:$4 sm:$0xff]  }
  0x6b   : > { %260 = vmatpush1.bf16.msra.mxu0 %v675_v2  ;;  %v214_v5 = vld [vmem:[%s182_s22] sm:$0xf]  ;;  %v849_v6 = vmov 0.0   ;;  %vm850_vm1 = vmmov 0   ;;  %v679_v13 = vld [vmem:[#allocation5 + $0x8] ss:$12 sps:$4 sm:$0xff]  }
  0x6c   : > { %261 = vmatprep.subr.bf16.mxu0 %v676_v3  ;;  %581 = vmatprep.subr.bf16.mxu1 %v849_v6  ;;  %v680_v14 = vld [vmem:[#allocation5 + $0x20] ss:$12 sps:$4 sm:$0xff]   ;;  %v343_v15 = vld [vmem:[#allocation7] sm:$0xff]  ;;  %vm384_vm2 = vcmask 64512   ;;  %vm400_vm3 = vcmask 1043456   ;;  %s560_s18 = sshll.u32 %s1041_s11, 3 }
  0x6d   : > { %585 = vmatprep.mubr.msk.bf16.mxu1 %vm850_vm1, %v849_v6  ;;  %582 = vmatpush3.bf16.msra.mxu1 %v679_v13  ;;  %s571_s20 = sshll.u32 %s893_s16, 7  ;;  %s212_s17 = scalar_lea.vmem [#allocation8], %s560_s18  ;;  %vm444_vm4 = vcmask 130048  }
  0x6e   : > { %583 = vmatprep.subr.bf16.mxu1 %v849_v6  ;;  %s460_s24 = sshll.u32 %s212_s17, 4  ;;  %s1066_s29 = scalar_lea.hbm %s1113_s3, %s571_s20  ;;  %s1068_s24 = int_to_ptr.vmem [resolvable:$true] %s460_s24 }
  0x6f   : > { %262 = vmatpush1.bf16.msra.mxu0 %v678_v4  ;;  %s447_s30 = scalar_lea.sflag [#allocation4], %s1041_s11  ;;  %s771_s23 = scalar_lea.vmem %s1068_s24, 128 }
  0x70   : > { %589 = vmatprep.subr.bf16.mxu0 %v849_v6  ;;  %p772_p8 = scmp.ne.s32.totalorder %s1068_s24, %s771_s23  ;;  %p1127_p0 = scmp.ne.s32.totalorder %s1122_s6, 0 }
  0x71   : > { %584 = vmatpush3.bf16.msra.mxu1 %v680_v14  ;;  %s851_s16 = smov [#allocation8]  }
  0x72   : > { %567 = vmatmul.mubr.msk.bf16.vlgmr.msra.gmra.mrb[0].mxu0 %vm255_vm0, %v214_v5  ;;  %595 = vmatprep.subr.bf16.mxu1 %v849_v6  ;;  %p773_p1 = pnand %p772_p8, %p1127_p0  ;;  %s775_s5 = sshll.u32 %s851_s16, 4  ;;  %s776_s5 = int_to_ptr.vmem [resolvable:$false] %s775_s5 }
  0x73   : > { %591 = vmatprep.mubr.msk.bf16.mxu0 %vm850_vm1, %v849_v6  ;;  %s777_s8 = scalar_lea.vmem %s776_s5, 256  ;;  %p778_p7 = scmp.lt.s32.totalorder %s1068_s24, %s776_s5 }
  0x74   : > { %586 = vmatmul.mubr.msk.bf16.vlgmr.msra.gmra.mrb[0].mxu1 %vm255_vm0, %v214_v5  ;;  %p774_p3 = pneg %p773_p1  ;;  %p779_p9 = scmp.lt.s32.totalorder %s777_s8, %s771_s23 }
  0x75   : > { %597 = vmatprep.mubr.msk.bf16.mxu1 %vm850_vm1, %v849_v6 }
  0x76   : > { %p780_p12 = por %p779_p9, %p778_p7 }
  0x78   : > { %p781_p2 = pnand %p780_p12, %p774_p3 }
 0x145   : > { %v293_v7 = vpop.f32.mrb[0].mxu0 }
 0x146   : > { %v295_v8 = vpop.f32.mrb[1].mxu0  ;;  %v340_v12 = vpack.c.bf16 %v293_v7, %v293_v7 }
 0x147   : > { %v341_v9 = vpack.c.bf16 %v295_v8, %v295_v8  ;;  %v297_v10 = vpop.f32.mrb[2].mxu0  ;;  %v334_v27 = vpop.f32.mrb[0].mxu1 }
 0x148   : > { %v298_v11 = vpop.f32.mrb[3].mxu0  ;;  %v587_v28 = vpop.f32.mrb[1].mxu1  ;;  %v342_v31 = vpack.c.bf16 %v334_v27, %v334_v27 }
 0x149   : > { %590 = vmatpush3.bf16.xpose.msra.mxu0 %v341_v9  ;;  %v337_v29 = vpop.f32.mrb[2].mxu1 }
 0x14a   : > { %v588_v30 = vpop.f32.mrb[3].mxu1  ;;  %v402_v32 = vsel %vm400_vm3, %v342_v31, 0 }
 0x14b   : > { %596 = vmatpush3.bf16.msra.mxu1 %v402_v32 }
 0x150   : > { %592 = vmatmul.mubr.bf16.vlgmr.msra.gmra.mrb[4].mxu0 %v340_v12 }
 0x223   : > { %v378_v16 = vpop.f32.mrb[4].mxu0 }
 0x224   : > { %v379_v17 = vadd.f32 %v378_v16, %v343_v15  ;;  %v593_v18 = vpop.f32.mrb[5].mxu0 }
 0x225   : > { %v381_v19 = vpop.f32.mrb[6].mxu0 }
 0x226   : > { %v594_v20 = vpop.f32.mrb[7].mxu0  ;;  %v385_v21 = vsel %vm384_vm2, %v379_v17, -inf }
 0x227   : > { %386 = vmax.xlane.f32.xlu0 %v385_v21 }
 0x2b4   : > { %v387_v22 = vpop.xlane.xlu0 %386 }
 0x2b5   : > { %v388_v23 = vsub.f32 %v379_v17, %v387_v22 }
 0x2b7   : > { %v389_v24 = vmul.f32 1.442695, %v388_v23 }
 0x2b9   : > { %681 = vpow2.f32 %v389_v24 }
 0x2c3   : > { %v682_v25 = vpop.eup %681 }
 0x2c4   : > { %v391_v26 = vsel %vm384_vm2, %v682_v25, 0.0 }
 0x2c5   : > { %392 = vadd.xlane.f32.xlu0 %v391_v26 }
 0x352   : > { %v393_v33 = vpop.xlane.xlu0 %392 }
 0x353   : > { %683 = vrcp.f32 %v393_v33 }
 0x35d   : > { %v684_v34 = vpop.eup %683 }
 0x35e   : > { %v395_v35 = vmul.f32 %v684_v34, %v682_v25 }
 0x360   : > { %v396_v36 = vpack.c.bf16 %v395_v35, %v395_v35 }
 0x362   : > { %598 = vmatmul.mubr.msk.bf16.vlgmr.msra.gmra.mrb[4].mxu1 %vm384_vm2, %v396_v36 }
 0x435   : > { %v438_v37 = vpop.f32.mrb[4].mxu1 }
 0x436   : > { %445 = vst.msk [vmem:[%s212_s17] sm:$0xff] %vm444_vm4, %v438_v37  ;;  %v599_v38 = vpop.f32.mrb[5].mxu1 }
 0x437   : > { %v441_v39 = vpop.f32.mrb[6].mxu1 }
 0x438   : > { %784 = shalt.err (!%p781_p2)
}
 0x439   : > { %s785_s9 = scalar_lea.hbm %s1066_s29, 128  ;;  %s789_s11 = scalar_lea.hbm %s1113_s3, 256 }
 0x43a   : > { %p786_p13 = scmp.ne.s32.totalorder %s1066_s29, %s785_s9  ;;  %p790_p4 = scmp.lt.u32.totalorder %s1066_s29, %s1113_s3 }
 0x43b   : > { %p791_p5 = scmp.lt.u32.totalorder %s789_s11, %s785_s9  ;;  %p793_p8 = scmp.lt.u32.totalorder %s785_s9, %s1066_s29 }
 0x43c   : > { %p787_p6 = pnand %p786_p13, %p1127_p0 }
 0x43d   : > { %p792_p11 = por %p791_p5, %p790_p4 }
 0x43e   : > { %p788_p10 = pneg %p787_p6 }
 0x43f   : > { %p794_p1 = por %p793_p8, %p792_p11 }
 0x441   : > { %p795_p3 = pnand %p794_p1, %p788_p10 }
 0x443   : > { %798 = shalt.err (!%p795_p3)
}
 0x444   : > { %611 = dma.vmem_to_hbm [thread:$0]  (%p1127_p0), %s1068_s24, 128, %s1066_s29, %s447_s30   ;;  %v600_v40 = vpop.f32.mrb[7].mxu1 }
 0x445 PF: > { %s472_s22 = sand.u32 1, %s829_s12   ;;  %p1128_p7 = scmp.ne.s32.totalorder %s1118_s19, 0 }
 0x446   : > { %p1129_p9 = scmp.ge.s32.totalorder %s841_s15, 2  ;;  %s473_s18 = scalar_lea.sflag [#allocation4], %s472_s22 }
 0x448   : > { %p625_p12 = pnand %p1129_p9, %p1128_p7 }
 0x44a   : > { %824 = dma.done.wait (!%p625_p12), %s473_s18, 128  }
 0x44b   : > { %826 = vsyncadd (!%p625_p12), %s473_s18, 4294967168  ;;  %p17_p2 = scmp.ge.s32.totalorder %s982_s4, 4   ;;  %s1130_s12 = smov %s833_s13 }
 0x44c   : > { %s1131_s13 = smov %s837_s14  ;;  %s1132_s14 = smov %s998_s7 }
 0x44d   : > { %s1133_s15 = smov %s982_s4  ;;  %19 = sbr.rel (!%p17_p2) target bundleno = 6 (0x6), region = 85 }
 0x454   :  { %478 = vsyncpa [#allocation3], 1 }
 0x455   :  { %480 = vsyncpa [#allocation3 + $0x1], 1 }
 0x456   :  { %481 = vsyncpa [#allocation6], 1 }
 0x457   :  { %482 = vsyncpa [#allocation4], 1 }
 0x458   :  { %484 = vsyncpa [#allocation4 + $0x1], 1 }

</bundles_post_ra>
